<compile_context>
chip_gen: v7x
topology: tpu7x:2x2x1
jax: 0.10.0
libtpu: 0.0.40
codegen_flags: <defaults>
</compile_context>

<pallas_src>
import math

import jax
import jax.numpy as jnp
import numpy as np
from jax.experimental import pallas as pl
from jax.experimental.pallas import tpu as pltpu


# ----------------------------------------------------------------------------
# Fused MHA kernel: one grid step = (batch b, head h)
#   inputs : q/k/v blocks (1,S,C); per-head weights (1,C,d)/(1,1,d); per-head
#            dense rows (1,d,C); dense bias (1,C)
#   output : (1,S,C) written once on the last head, accumulated in f32 scratch
# ----------------------------------------------------------------------------
def _mha_fused_kernel(q_ref, k_ref, v_ref,
                      wq_ref, wk_ref, wv_ref,
                      bq_ref, bk_ref, bv_ref,
                      wd_ref, bd_ref,
                      o_ref, acc_ref):
    h = pl.program_id(1)

    @pl.when(h == 0)
    def _init():
        acc_ref[...] = jnp.zeros_like(acc_ref)

    depth = wq_ref.shape[2]                 # static
    scale = 1.0 / math.sqrt(depth)

    qb = q_ref[0]                           # (S, C)
    kb = k_ref[0]
    vb = v_ref[0]

    # per-head projections: (S, C) @ (C, d) + (1, d) -> (S, d)
    qh = jnp.dot(qb, wq_ref[0], preferred_element_type=jnp.float32) + bq_ref[0]
    kh = jnp.dot(kb, wk_ref[0], preferred_element_type=jnp.float32) + bk_ref[0]
    vh = jnp.dot(vb, wv_ref[0], preferred_element_type=jnp.float32) + bv_ref[0]

    # scaled dot-product attention; contract depth axis directly (no transpose op)
    logits = jax.lax.dot_general(
        qh, kh, (((1,), (1,)), ((), ())),
        preferred_element_type=jnp.float32) * scale          # (S, S)
    m = jnp.max(logits, axis=-1, keepdims=True)
    e = jnp.exp(logits - m)
    attn = e / jnp.sum(e, axis=-1, keepdims=True)
    oh = jnp.dot(attn, vh, preferred_element_type=jnp.float32)   # (S, d)

    # this head's slice of the final dense layer: (S, d) @ (d, C) -> (S, C)
    partial = jnp.dot(oh, wd_ref[0], preferred_element_type=jnp.float32)
    acc_ref[...] = acc_ref[...] + partial[None, :, :]

    @pl.when(h == pl.num_programs(1) - 1)
    def _finalize():
        o_ref[...] = (acc_ref[...] + bd_ref[...][:, None, :]).astype(o_ref.dtype)


def mha_forward(q, k, v, wq_h, wk_h, wv_h, bq_h, bk_h, bv_h, wd_h, bd2):
    """q/k/v: (B,S,C); w*_h: (H,C,d); b*_h: (H,1,d); wd_h: (H,d,C); bd2: (1,C)."""
    B, S, C = q.shape
    H, _, d = wq_h.shape

    qkv_spec = pl.BlockSpec((1, S, C), lambda b, h: (b, 0, 0))
    w_spec = pl.BlockSpec((1, C, d), lambda b, h: (h, 0, 0))
    bias_spec = pl.BlockSpec((1, 1, d), lambda b, h: (h, 0, 0))
    wd_spec = pl.BlockSpec((1, d, C), lambda b, h: (h, 0, 0))
    bd_spec = pl.BlockSpec((1, C), lambda b, h: (0, 0))

    return pl.pallas_call(
        _mha_fused_kernel,
        out_shape=jax.ShapeDtypeStruct((B, S, C), q.dtype),
        grid_spec=pltpu.PrefetchScalarGridSpec(
            num_scalar_prefetch=0,
            grid=(B, H),
            in_specs=[qkv_spec, qkv_spec, qkv_spec,
                      w_spec, w_spec, w_spec,
                      bias_spec, bias_spec, bias_spec,
                      wd_spec, bd_spec],
            out_specs=pl.BlockSpec((1, S, C), lambda b, h: (b, 0, 0)),
            scratch_shapes=[pltpu.VMEM((1, S, C), jnp.float32)],
        ),
        compiler_params=pltpu.CompilerParams(
            dimension_semantics=("parallel", "arbitrary")),
    )(q, k, v, wq_h, wk_h, wv_h, bq_h, bk_h, bv_h, wd_h, bd2)


# ----------------------------------------------------------------------------
# Module wrapper: params generated once, stored directly in kernel layout
# ----------------------------------------------------------------------------
class MultiHeadAttentionPallas:
    def __init__(self, num_heads, channels, key):
        assert channels % num_heads == 0, "channels should be divisible by num_heads"
        self.num_heads = num_heads
        self.channels = channels
        self.depth = channels // num_heads

        ks = jax.random.split(key, 8)
        limit = 1.0 / math.sqrt(channels)

        def linear(kw, kb):
            w = jax.random.uniform(kw, (channels, channels), jnp.float32, -limit, limit)
            b = jax.random.uniform(kb, (channels,), jnp.float32, -limit, limit)
            return w, b  # y = x @ w + b

        self.wq, self.bq = linear(ks[0], ks[1])
        self.wk, self.bk = linear(ks[2], ks[3])
        self.wv, self.bv = linear(ks[4], ks[5])
        self.wd, self.bd = linear(ks[6], ks[7])

        # Hoisted re-layout: pre-slice per head so the kernel never splits heads.
        H, d, C = num_heads, self.depth, channels
        self.wq_h = jnp.transpose(self.wq.reshape(C, H, d), (1, 0, 2))   # (H, C, d)
        self.wk_h = jnp.transpose(self.wk.reshape(C, H, d), (1, 0, 2))
        self.wv_h = jnp.transpose(self.wv.reshape(C, H, d), (1, 0, 2))
        self.bq_h = self.bq.reshape(H, 1, d)
        self.bk_h = self.bk.reshape(H, 1, d)
        self.bv_h = self.bv.reshape(H, 1, d)
        self.wd_h = self.wd.reshape(H, d, C)                             # (H, d, C)
        self.bd_2 = self.bd.reshape(1, C)

    def __call__(self, q, k, v):
        return mha_forward(q, k, v,
                           self.wq_h, self.wk_h, self.wv_h,
                           self.bq_h, self.bk_h, self.bv_h,
                           self.wd_h, self.bd_2)


# ----------------------------------------------------------------------------
# Pure-JAX reference (mirrors the PyTorch forward exactly)
# ----------------------------------------------------------------------------
def mha_reference(q, k, v, m: MultiHeadAttentionPallas):
    B, S, C = q.shape
    H, d = m.num_heads, m.depth

    def split(x):
        return jnp.transpose(x.reshape(B, S, H, d), (0, 2, 1, 3))   # (B,H,S,d)

    Q = split(q @ m.wq + m.bq)
    K = split(k @ m.wk + m.bk)
    V = split(v @ m.wv + m.bv)
    logits = jnp.einsum("bhqd,bhkd->bhqk", Q, K) / jnp.sqrt(jnp.float32(d))
    attn = jax.nn.softmax(logits, axis=-1)
    O = jnp.einsum("bhqk,bhkd->bhqd", attn, V)
    O = jnp.transpose(O, (0, 2, 1, 3)).reshape(B, S, C)
    return O @ m.wd + m.bd


# ----------------------------------------------------------------------------
# main
# ----------------------------------------------------------------------------
if __name__ == "__main__":
    B, S, C, num_heads = 2, 16, 32, 4

    key = jax.random.PRNGKey(0)
    key, km, kq, kk, kv = jax.random.split(key, 5)

    model = MultiHeadAttentionPallas(num_heads, C, km)

    q = jax.random.normal(kq, (B, S, C), jnp.float32)
    k = jax.random.normal(kk, (B, S, C), jnp.float32)
    v = jax.random.normal(kv, (B, S, C), jnp.float32)

    out = model(q, k, v)
    out = jax.block_until_ready(out)
    assert out.shape == (B, S, C)

    ref = mha_reference(q, k, v, model)
    np.testing.assert_allclose(np.asarray(out), np.asarray(ref), rtol=1e-4, atol=1e-4)

    print("KERNEL_OK")
</pallas_src>

<mosaic_0001>
module attributes {stable_mosaic.version = 11 : i64} {
  func.func @_mha_fused_kernel(%arg0: i32, %arg1: i32, %arg2: memref<1x16x32xf32, #tpu.memory_space<vmem>>, %arg3: memref<1x16x32xf32, #tpu.memory_space<vmem>>, %arg4: memref<1x16x32xf32, #tpu.memory_space<vmem>>, %arg5: memref<1x32x8xf32, #tpu.memory_space<vmem>>, %arg6: memref<1x32x8xf32, #tpu.memory_space<vmem>>, %arg7: memref<1x32x8xf32, #tpu.memory_space<vmem>>, %arg8: memref<1x1x8xf32, #tpu.memory_space<vmem>>, %arg9: memref<1x1x8xf32, #tpu.memory_space<vmem>>, %arg10: memref<1x1x8xf32, #tpu.memory_space<vmem>>, %arg11: memref<1x8x32xf32, #tpu.memory_space<vmem>>, %arg12: memref<1x32xf32, #tpu.memory_space<vmem>>, %arg13: memref<1x16x32xf32, #tpu.memory_space<vmem>>, %arg14: memref<1x16x32xf32, #tpu.memory_space<vmem>>) attributes {dimension_semantics = [#tpu.dimension_semantics<parallel>, #tpu.dimension_semantics<arbitrary>], iteration_bounds = array<i64: 2, 4>, scalar_prefetch = 0 : i64, scratch_operands = 1 : i64, tpu.core_type = #tpu.core_type<tc>, window_params = [{transform_indices = @transform_0, window_bounds = array<i64: 1, 16, 32>}, {transform_indices = @transform_1, window_bounds = array<i64: 1, 16, 32>}, {transform_indices = @transform_2, window_bounds = array<i64: 1, 16, 32>}, {transform_indices = @transform_3, window_bounds = array<i64: 1, 32, 8>}, {transform_indices = @transform_4, window_bounds = array<i64: 1, 32, 8>}, {transform_indices = @transform_5, window_bounds = array<i64: 1, 32, 8>}, {transform_indices = @transform_6, window_bounds = array<i64: 1, 1, 8>}, {transform_indices = @transform_7, window_bounds = array<i64: 1, 1, 8>}, {transform_indices = @transform_8, window_bounds = array<i64: 1, 1, 8>}, {transform_indices = @transform_9, window_bounds = array<i64: 1, 8, 32>}, {pipeline_mode = #tpu.pipeline_mode<synchronous>, transform_indices = @transform_10, window_bounds = array<i64: 1, 32>}, {transform_indices = @transform_11, window_bounds = array<i64: 1, 16, 32>}]} {
    %c0_i32 = arith.constant 0 : i32
    %0 = arith.cmpi eq, %arg1, %c0_i32 : i32
    %1 = arith.extui %0 : i1 to i32
    %c0_i32_0 = arith.constant 0 : i32
    %2 = arith.cmpi ne, %1, %c0_i32_0 : i32
    scf.if %2 {
      %cst_45 = arith.constant 0.000000e+00 : f32
      %53 = vector.broadcast %cst_45 : f32 to vector<1x16x32xf32>
      %c0_46 = arith.constant 0 : index
      %c0_47 = arith.constant 0 : index
      %c0_48 = arith.constant 0 : index
      %54 = vector.load %arg14[%c0_46, %c0_47, %c0_48] : memref<1x16x32xf32, #tpu.memory_space<vmem>>, vector<1x16x32xf32>
      tpu.vector_store %arg14[%c0_46, %c0_47, %c0_48], %53 {strides = array<i32>} : memref<1x16x32xf32, #tpu.memory_space<vmem>>, vector<1x16x32xf32>,
    } else {
    }
    %c0 = arith.constant 0 : index
    %c0_1 = arith.constant 0 : index
    %c0_2 = arith.constant 0 : index
    %3 = vector.load %arg2[%c0, %c0_1, %c0_2] : memref<1x16x32xf32, #tpu.memory_space<vmem>>, vector<1x16x32xf32>
    %4 = vector.shape_cast %3 : vector<1x16x32xf32> to vector<16x32xf32>
    %c0_3 = arith.constant 0 : index
    %c0_4 = arith.constant 0 : index
    %c0_5 = arith.constant 0 : index
    %5 = vector.load %arg3[%c0_3, %c0_4, %c0_5] : memref<1x16x32xf32, #tpu.memory_space<vmem>>, vector<1x16x32xf32>
    %6 = vector.shape_cast %5 : vector<1x16x32xf32> to vector<16x32xf32>
    %c0_6 = arith.constant 0 : index
    %c0_7 = arith.constant 0 : index
    %c0_8 = arith.constant 0 : index
    %7 = vector.load %arg4[%c0_6, %c0_7, %c0_8] : memref<1x16x32xf32, #tpu.memory_space<vmem>>, vector<1x16x32xf32>
    %8 = vector.shape_cast %7 : vector<1x16x32xf32> to vector<16x32xf32>
    %c0_9 = arith.constant 0 : index
    %c0_10 = arith.constant 0 : index
    %c0_11 = arith.constant 0 : index
    %9 = vector.load %arg5[%c0_9, %c0_10, %c0_11] : memref<1x32x8xf32, #tpu.memory_space<vmem>>, vector<1x32x8xf32>
    %10 = vector.shape_cast %9 : vector<1x32x8xf32> to vector<32x8xf32>
    %cst = arith.constant dense<0.000000e+00> : vector<16x8xf32>
    %11 = tpu.matmul %4, %10, %cst {dimension_numbers = #tpu.dot_dimension_numbers<[1], [0], [0], [1], [0, 0, 1, 1], [], []>} : vector<16x32xf32>, vector<32x8xf32>, vector<16x8xf32> -> vector<16x8xf32>
    %c0_12 = arith.constant 0 : index
    %c0_13 = arith.constant 0 : index
    %c0_14 = arith.constant 0 : index
    %12 = vector.load %arg8[%c0_12, %c0_13, %c0_14] : memref<1x1x8xf32, #tpu.memory_space<vmem>>, vector<1x1x8xf32>
    %13 = vector.shape_cast %12 : vector<1x1x8xf32> to vector<1x8xf32>
    %14 = vector.broadcast %13 : vector<1x8xf32> to vector<16x8xf32>
    %15 = arith.addf %11, %14 : vector<16x8xf32>
    %c0_15 = arith.constant 0 : index
    %c0_16 = arith.constant 0 : index
    %c0_17 = arith.constant 0 : index
    %16 = vector.load %arg6[%c0_15, %c0_16, %c0_17] : memref<1x32x8xf32, #tpu.memory_space<vmem>>, vector<1x32x8xf32>
    %17 = vector.shape_cast %16 : vector<1x32x8xf32> to vector<32x8xf32>
    %cst_18 = arith.constant dense<0.000000e+00> : vector<16x8xf32>
    %18 = tpu.matmul %6, %17, %cst_18 {dimension_numbers = #tpu.dot_dimension_numbers<[1], [0], [0], [1], [0, 0, 1, 1], [], []>} : vector<16x32xf32>, vector<32x8xf32>, vector<16x8xf32> -> vector<16x8xf32>
    %c0_19 = arith.constant 0 : index
    %c0_20 = arith.constant 0 : index
    %c0_21 = arith.constant 0 : index
    %19 = vector.load %arg9[%c0_19, %c0_20, %c0_21] : memref<1x1x8xf32, #tpu.memory_space<vmem>>, vector<1x1x8xf32>
    %20 = vector.shape_cast %19 : vector<1x1x8xf32> to vector<1x8xf32>
    %21 = vector.broadcast %20 : vector<1x8xf32> to vector<16x8xf32>
    %22 = arith.addf %18, %21 : vector<16x8xf32>
    %c0_22 = arith.constant 0 : index
    %c0_23 = arith.constant 0 : index
    %c0_24 = arith.constant 0 : index
    %23 = vector.load %arg7[%c0_22, %c0_23, %c0_24] : memref<1x32x8xf32, #tpu.memory_space<vmem>>, vector<1x32x8xf32>
    %24 = vector.shape_cast %23 : vector<1x32x8xf32> to vector<32x8xf32>
    %cst_25 = arith.constant dense<0.000000e+00> : vector<16x8xf32>
    %25 = tpu.matmul %8, %24, %cst_25 {dimension_numbers = #tpu.dot_dimension_numbers<[1], [0], [0], [1], [0, 0, 1, 1], [], []>} : vector<16x32xf32>, vector<32x8xf32>, vector<16x8xf32> -> vector<16x8xf32>
    %c0_26 = arith.constant 0 : index
    %c0_27 = arith.constant 0 : index
    %c0_28 = arith.constant 0 : index
    %26 = vector.load %arg10[%c0_26, %c0_27, %c0_28] : memref<1x1x8xf32, #tpu.memory_space<vmem>>, vector<1x1x8xf32>
    %27 = vector.shape_cast %26 : vector<1x1x8xf32> to vector<1x8xf32>
    %28 = vector.broadcast %27 : vector<1x8xf32> to vector<16x8xf32>
    %29 = arith.addf %25, %28 : vector<16x8xf32>
    %cst_29 = arith.constant dense<0.000000e+00> : vector<16x16xf32>
    %30 = tpu.matmul %15, %22, %cst_29 {dimension_numbers = #tpu.dot_dimension_numbers<[1], [1], [0], [0], [0, 0, 1, 0], [], []>} : vector<16x8xf32>, vector<16x8xf32>, vector<16x16xf32> -> vector<16x16xf32>
    %cst_30 = arith.constant 0.353553385 : f32
    %31 = vector.broadcast %cst_30 : f32 to vector<16x16xf32>
    %32 = arith.mulf %30, %31 : vector<16x16xf32>
    %cst_31 = arith.constant dense<0xFF800000> : vector<16xf32>
    %33 = vector.multi_reduction <maximumf>, %32, %cst_31 [1] : vector<16x16xf32> to vector<16xf32>
    %34 = vector.shape_cast %33 : vector<16xf32> to vector<16x1xf32>
    %35 = vector.broadcast %34 : vector<16x1xf32> to vector<16x16xf32>
    %36 = arith.subf %32, %35 : vector<16x16xf32>
    %37 = math.exp %36 : vector<16x16xf32>
    %cst_32 = arith.constant dense<0.000000e+00> : vector<16xf32>
    %38 = vector.multi_reduction <add>, %37, %cst_32 [1] : vector<16x16xf32> to vector<16xf32>
    %39 = vector.shape_cast %38 : vector<16xf32> to vector<16x1xf32>
    %40 = vector.broadcast %39 : vector<16x1xf32> to vector<16x16xf32>
    %41 = arith.divf %37, %40 : vector<16x16xf32>
    %cst_33 = arith.constant dense<0.000000e+00> : vector<16x8xf32>
    %42 = tpu.matmul %41, %29, %cst_33 {dimension_numbers = #tpu.dot_dimension_numbers<[1], [0], [0], [1], [0, 0, 1, 1], [], []>} : vector<16x16xf32>, vector<16x8xf32>, vector<16x8xf32> -> vector<16x8xf32>
    %c0_34 = arith.constant 0 : index
    %c0_35 = arith.constant 0 : index
    %c0_36 = arith.constant 0 : index
    %43 = vector.load %arg11[%c0_34, %c0_35, %c0_36] : memref<1x8x32xf32, #tpu.memory_space<vmem>>, vector<1x8x32xf32>
    %44 = vector.shape_cast %43 : vector<1x8x32xf32> to vector<8x32xf32>
    %cst_37 = arith.constant dense<0.000000e+00> : vector<16x32xf32>
    %45 = tpu.matmul %42, %44, %cst_37 {dimension_numbers = #tpu.dot_dimension_numbers<[1], [0], [0], [1], [0, 0, 1, 1], [], []>} : vector<16x8xf32>, vector<8x32xf32>, vector<16x32xf32> -> vector<16x32xf32>
    %c0_38 = arith.constant 0 : index
    %c0_39 = arith.constant 0 : index
    %c0_40 = arith.constant 0 : index
    %46 = vector.load %arg14[%c0_38, %c0_39, %c0_40] : memref<1x16x32xf32, #tpu.memory_space<vmem>>, vector<1x16x32xf32>
    %47 = vector.shape_cast %45 : vector<16x32xf32> to vector<1x16x32xf32>
    %48 = arith.addf %46, %47 : vector<1x16x32xf32>
    %c0_41 = arith.constant 0 : index
    %c0_42 = arith.constant 0 : index
    %c0_43 = arith.constant 0 : index
    %49 = vector.load %arg14[%c0_41, %c0_42, %c0_43] : memref<1x16x32xf32, #tpu.memory_space<vmem>>, vector<1x16x32xf32>
    tpu.vector_store %arg14[%c0_41, %c0_42, %c0_43], %48 {strides = array<i32>} : memref<1x16x32xf32, #tpu.memory_space<vmem>>, vector<1x16x32xf32>,
    %c3_i32 = arith.constant 3 : i32
    %50 = arith.cmpi eq, %arg1, %c3_i32 : i32
    %51 = arith.extui %50 : i1 to i32
    %c0_i32_44 = arith.constant 0 : i32
    %52 = arith.cmpi ne, %51, %c0_i32_44 : i32
    scf.if %52 {
      %c0_45 = arith.constant 0 : index
      %c0_46 = arith.constant 0 : index
      %c0_47 = arith.constant 0 : index
      %53 = vector.load %arg14[%c0_45, %c0_46, %c0_47] : memref<1x16x32xf32, #tpu.memory_space<vmem>>, vector<1x16x32xf32>
      %c0_48 = arith.constant 0 : index
      %c0_49 = arith.constant 0 : index
      %54 = vector.load %arg12[%c0_48, %c0_49] : memref<1x32xf32, #tpu.memory_space<vmem>>, vector<1x32xf32>
      %55 = vector.shape_cast %54 : vector<1x32xf32> to vector<1x1x32xf32>
      %56 = vector.broadcast %55 : vector<1x1x32xf32> to vector<1x16x32xf32>
      %57 = arith.addf %53, %56 : vector<1x16x32xf32>
      %c0_50 = arith.constant 0 : index
      %c0_51 = arith.constant 0 : index
      %c0_52 = arith.constant 0 : index
      %58 = vector.load %arg13[%c0_50, %c0_51, %c0_52] : memref<1x16x32xf32, #tpu.memory_space<vmem>>, vector<1x16x32xf32>
      tpu.vector_store %arg13[%c0_50, %c0_51, %c0_52], %57 {strides = array<i32>} : memref<1x16x32xf32, #tpu.memory_space<vmem>>, vector<1x16x32xf32>,
    } else {
    }
    return
  }
  func.func @transform_0(%arg0: i32, %arg1: i32) -> (i32, i32, i32) {
    %c0_i32 = arith.constant 0 : i32
    %c0_i32_0 = arith.constant 0 : i32
    %c0_i32_1 = arith.constant 0 : i32
    return %arg0, %c0_i32, %c0_i32_0 : i32, i32, i32
  }
  func.func @transform_1(%arg0: i32, %arg1: i32) -> (i32, i32, i32) {
    %c0_i32 = arith.constant 0 : i32
    %c0_i32_0 = arith.constant 0 : i32
    %c0_i32_1 = arith.constant 0 : i32
    return %arg0, %c0_i32, %c0_i32_0 : i32, i32, i32
  }
  func.func @transform_2(%arg0: i32, %arg1: i32) -> (i32, i32, i32) {
    %c0_i32 = arith.constant 0 : i32
    %c0_i32_0 = arith.constant 0 : i32
    %c0_i32_1 = arith.constant 0 : i32
    return %arg0, %c0_i32, %c0_i32_0 : i32, i32, i32
  }
  func.func @transform_3(%arg0: i32, %arg1: i32) -> (i32, i32, i32) {
    %c0_i32 = arith.constant 0 : i32
    %c0_i32_0 = arith.constant 0 : i32
    %c0_i32_1 = arith.constant 0 : i32
    return %arg1, %c0_i32, %c0_i32_0 : i32, i32, i32
  }
  func.func @transform_4(%arg0: i32, %arg1: i32) -> (i32, i32, i32) {
    %c0_i32 = arith.constant 0 : i32
    %c0_i32_0 = arith.constant 0 : i32
    %c0_i32_1 = arith.constant 0 : i32
    return %arg1, %c0_i32, %c0_i32_0 : i32, i32, i32
  }
  func.func @transform_5(%arg0: i32, %arg1: i32) -> (i32, i32, i32) {
    %c0_i32 = arith.constant 0 : i32
    %c0_i32_0 = arith.constant 0 : i32
    %c0_i32_1 = arith.constant 0 : i32
    return %arg1, %c0_i32, %c0_i32_0 : i32, i32, i32
  }
  func.func @transform_6(%arg0: i32, %arg1: i32) -> (i32, i32, i32) {
    %c0_i32 = arith.constant 0 : i32
    %c0_i32_0 = arith.constant 0 : i32
    %c0_i32_1 = arith.constant 0 : i32
    return %arg1, %c0_i32, %c0_i32_0 : i32, i32, i32
  }
  func.func @transform_7(%arg0: i32, %arg1: i32) -> (i32, i32, i32) {
    %c0_i32 = arith.constant 0 : i32
    %c0_i32_0 = arith.constant 0 : i32
    %c0_i32_1 = arith.constant 0 : i32
    return %arg1, %c0_i32, %c0_i32_0 : i32, i32, i32
  }
  func.func @transform_8(%arg0: i32, %arg1: i32) -> (i32, i32, i32) {
    %c0_i32 = arith.constant 0 : i32
    %c0_i32_0 = arith.constant 0 : i32
    %c0_i32_1 = arith.constant 0 : i32
    return %arg1, %c0_i32, %c0_i32_0 : i32, i32, i32
  }
  func.func @transform_9(%arg0: i32, %arg1: i32) -> (i32, i32, i32) {
    %c0_i32 = arith.constant 0 : i32
    %c0_i32_0 = arith.constant 0 : i32
    %c0_i32_1 = arith.constant 0 : i32
    return %arg1, %c0_i32, %c0_i32_0 : i32, i32, i32
  }
  func.func @transform_10(%arg0: i32, %arg1: i32) -> (i32, i32) {
    %c0_i32 = arith.constant 0 : i32
    %c0_i32_0 = arith.constant 0 : i32
    %c0_i32_1 = arith.constant 0 : i32
    return %c0_i32, %c0_i32_0 : i32, i32
  }
  func.func @transform_11(%arg0: i32, %arg1: i32) -> (i32, i32, i32) {
    %c0_i32 = arith.constant 0 : i32
    %c0_i32_0 = arith.constant 0 : i32
    %c0_i32_1 = arith.constant 0 : i32
    return %arg0, %c0_i32, %c0_i32_0 : i32, i32, i32
  }
}

</mosaic_0001>

<bundles_post_ra>
// kernel: tpu_custom_call.1
= control target key start
LH: loop header
LB: loop body
LE: loop exit
PB: predicated region body
PF: predicated region fallthrough
CT: control target
= control target key end

     0   :  { %s1982_s0 = inlined_call_operand.vmem [shape: f32[2,16,32], index: 0, kind: input, shape index: {}]   ;;  %s1983_s1 = inlined_call_operand.vmem [shape: f32[2,16,32], index: 1, kind: input, shape index: {}]   ;;  %s1984_s2 = inlined_call_operand.vmem [shape: f32[2,16,32], index: 2, kind: input, shape index: {}]   ;;  %s1985_s3 = inlined_call_operand.vmem [shape: f32[4,32,8], index: 3, kind: input, shape index: {}]   ;;  %s1986_s4 = inlined_call_operand.vmem [shape: f32[4,32,8], index: 4, kind: input, shape index: {}]   ;;  %s1987_s5 = inlined_call_operand.vmem [shape: f32[4,32,8], index: 5, kind: input, shape index: {}]   ;;  %s1988_s6 = inlined_call_operand.vmem [shape: f32[4,1,8], index: 6, kind: input, shape index: {}]   ;;  %s1989_s7 = inlined_call_operand.vmem [shape: f32[4,1,8], index: 7, kind: input, shape index: {}]   ;;  %s1990_s8 = inlined_call_operand.vmem [shape: f32[4,1,8], index: 8, kind: input, shape index: {}]   ;;  %s1991_s9 = inlined_call_operand.vmem [shape: f32[4,8,32], index: 9, kind: input, shape index: {}]   ;;  %s1992_s10 = inlined_call_operand.vmem [shape: f32[1,32], index: 10, kind: input, shape index: {}]   ;;  %s1993_s11 = inlined_call_operand.hbm [shape: f32[2,16,32], index: 11, kind: output, shape index: {}]  }
   0x1   :  { %2008 = sst [smem:[#allocation18_spill]] %s1982_s0 }
   0x2   :  { %2009 = sst [smem:[#allocation19_spill]] %s1983_s1 }
   0x3   :  { %2010 = sst [smem:[#allocation20_spill]] %s1984_s2 }
   0x4   :  { %2011 = sst [smem:[#allocation21_spill]] %s1985_s3 }
   0x5   :  { %2012 = sst [smem:[#allocation22_spill]] %s1986_s4 }
   0x6   :  { %2013 = sst [smem:[#allocation23_spill]] %s1993_s11 }
   0x7   :  { %16 = vsyncpa [#allocation4], 0 }
   0x8   :  { %18 = vsyncpa [#allocation4 + $0x1], 0  ;;  %s1739_s17 = smov 0   ;;  %s1741_s18 = smov 0  }
   0x9   :  { %s1743_s19 = smov 0   ;;  %s1745_s20 = smov 0  }
   0xa   :  { %s1747_s21 = smov 0   ;;  %s1749_s22 = smov 0  }
   0xb   :  { %s1751_s23 = smov 0   ;;  %s1753_s24 = smov 0  }
   0xc LB: > { %2014 = sst [smem:[#allocation6_spill]] %s1645_s17  ;;  %s1331_s25 = sadd.s32 4294967295, %s1673_s24   ;;  %s1673_s24 = sphi %s1753_s24, %s24_s24   ;;  %s1669_s23 = sphi %s1751_s23, %s2047_s23   ;;  %s1665_s22 = sphi %s1749_s22, %s2046_s22   ;;  %s1661_s21 = sphi %s1747_s21, %s2045_s21   ;;  %s1657_s20 = sphi %s1745_s20, %s2044_s20   ;;  %s1653_s19 = sphi %s1743_s19, %s2043_s19   ;;  %s1649_s18 = sphi %s1741_s18, %s2042_s18   ;;  %s1645_s17 = sphi %s1739_s17, %s2041_s17  }
   0xd   : > { %2015 = sst [smem:[#allocation7_spill]] %s1649_s18  ;;  %s1332_s26 = sadd.s32 4294967294, %s1673_s24  }
   0xe   : > { %2016 = sst [smem:[#allocation8_spill]] %s1653_s19  ;;  %s33_s27 = sadd.s32 1, %s1665_s22 }
   0xf   : > { %2017 = sst [smem:[#allocation9_spill]] %s1661_s21  ;;  %p34_p0 = scmp.ge.s32.totalorder %s33_s27, 4 }
  0x10   : > { %2018 = sst [smem:[#allocation10_spill]] %s1665_s22  ;;  %s36_s28 = sadd.s32 1, %s1669_s23 }
  0x11   : > { %2019 = sst [smem:[#allocation11_spill]] %s1669_s23  ;;  %p334_p1 = scmp.ne.s32.totalorder %s1653_s19, %s1649_s18 }
  0x12   : > { %2020 = sst [smem:[#allocation12_spill]] %s1673_s24  ;;  %p335_p2 = scmp.eq.s32.totalorder %s1331_s25, 7 }
  0x13   : > { %s2049_s27 = smov (%p34_p0, %s33_s27), 0  ;;  %s2051_s28 = smov (!%p34_p0, %s36_s28), %s1669_s23 }
  0x14   : > { %2021 = sst [smem:[#allocation13_spill]] %s2049_s27  ;;  %p1788_p3 = por %p335_p2, %p334_p1 }
  0x15   : > { %p340_p4 = scmp.ne.s32.totalorder %s1649_s18, %s1645_s17  ;;  %p38_p5 = scmp.ge.s32.totalorder %s2051_s28, 2 }
  0x16   : > { %s2022_s29 = scalar_select %p1788_p3, 1, 0 }
  0x17   : > { %p341_p6 = scmp.eq.s32.totalorder %s1332_s26, 7  ;;  %p1335_p7 = scmp.ge.s32.totalorder %s1673_s24, 1 }
  0x18   : > { %2023 = sst [smem:[#allocation14_spill]] %s2022_s29  ;;  %p435_p8 = scmp.lt.s32.totalorder %s1673_s24, 9 }
  0x19   : > { %s2053_s28 = smov (%p38_p5, %s2051_s28), 0  ;;  %p1798_p9 = por %p341_p6, %p340_p4 }
  0x1a   : > { %2024 = sst [smem:[#allocation15_spill]] %s2053_s28  ;;  %p436_p10 = pnand %p1335_p7, %p435_p8 }
  0x1b   : > { %s2025_s30 = scalar_select %p1798_p9, 1, 0 }
  0x1c   : > { %s321_s12 = ssub.s32 %s1669_s23, %s2053_s28  ;;  %s324_s13 = sadd.s32 1, %s1653_s19 }
  0x1d   : > { %2026 = sst [smem:[#allocation16_spill]] %s2025_s30  ;;  %p322_p11 = scmp.eq.s32.totalorder %s321_s12, 0 }
  0x1e   : > { %439 = sbr.rel (%p436_p10) target bundleno = 1289 (0x509), region = 64  ;;  %s1997_s15 = sand.u32 (!%p436_p10), 1, %s1649_s18  }
  0x1f   : > { %s1806_s14 = scalar_select %p322_p11, %s1653_s19, %s324_s13  }
  0x20   : > { %p513_p12 = scmp.lt.s32.totalorder (!%p436_p10), %s1661_s21, 1  ;;  %s1336_s16 = sshll.u32 (!%p436_p10), %s1997_s15, 4 }
  0x21   : > { %2027 = sst [smem:[#allocation17_spill]] %s1806_s14  ;;  %p528_p13 = scmp.lt.s32.totalorder (!%p436_p10), %s1657_s20, 3 }
  0x22   : > { %s2028_s0 = sld [smem:[#allocation18_spill]] (!%p436_p10)  ;;  %s2029_s1 = sld [smem:[#allocation19_spill]] (!%p436_p10) }
  0x23   : > { %s2030_s2 = sld [smem:[#allocation20_spill]] (!%p436_p10)  ;;  %s2031_s3 = sld [smem:[#allocation21_spill]] (!%p436_p10) }
  0x24   : > { %s2032_s4 = sld [smem:[#allocation22_spill]] (!%p436_p10)  ;;  %p1350_p0 = scmp.ne.s32.totalorder (!%p436_p10), %s1657_s20, 0 }
  0x25   : > { %s514_s25 = scalar_select %p513_p12, %s1661_s21, 1 }
  0x26   : > { %s1815_s26 = scalar_select %p528_p13, %s1657_s20, 3 }
  0x27   : > { %s1375_s12 = sshll.u32 %s514_s25, 4  ;;  %vm560_vm0 = vcmask (!%p1350_p0), 261120   ;;  %v1675_v0 = vmov (!%p1350_p0), 0.0  }
  0x28   : > { %s1820_s27 = scalar_lea.vmem %s2028_s0, %s1375_s12  ;;  %s1825_s14 = scalar_lea.vmem %s2029_s1, %s1375_s12  ;;  %561 = vst.msk [vmem:[#allocation2] sm:$0xff] (!%p1350_p0), %vm560_vm0, %v1675_v0  ;;  %562 = vst.msk [vmem:[#allocation2 + $0x8] sm:$0xff] (!%p1350_p0), %vm560_vm0, %v1675_v0 }
  0x29   : > { %s1830_s30 = scalar_lea.vmem %s2030_s2, %s1375_s12  ;;  %s1378_s17 = sshll.u32 %s1815_s26, 5 }
  0x2a   : > { %s532_s25 = scalar_lea.vmem %s2031_s3, %s1378_s17  ;;  %s537_s28 = scalar_lea.vmem %s2032_s4, %s1378_s17 }
  0x2b   : > { %s1842_s22 = scalar_lea.vmem %s1987_s5, %s1378_s17  ;;  %s545_s19 = scalar_lea.vmem %s1988_s6, %s1815_s26 }
  0x2c   : > { %s548_s2 = scalar_lea.vmem %s1989_s7, %s1815_s26  ;;  %s551_s24 = scalar_lea.vmem %s1990_s8, %s1815_s26 }
  0x2d   : > { %s1349_s3 = sshll.u32 %s1815_s26, 3  ;;  %s1862_s0 = scalar_lea.vmem [#allocation3], %s1336_s16 }
  0x2e   : > { %s1860_s4 = scalar_lea.vmem %s1991_s9, %s1349_s3  ;;  %559 = sbr.rel (%p1350_p0) target bundleno = 53 (0x35), region = 68 }
  0x35 PF: > { %v662_v1 = vld [vmem:[%s537_s28] sm:$0xff]  ;;  %v663_v2 = vld [vmem:[%s537_s28 + $0x8] sm:$0xff]  ;;  %v664_v3 = vld [vmem:[%s537_s28 + $0x10] sm:$0xff]  ;;  %vm580_vm1 = vcmask 261120   ;;  %vm846_vm2 = vcmask 64512   ;;  %vm936_vm4 = vcmask 130048  }
  0x36   : > { %v1471_v4 = vpack.c.bf16 %v663_v2, %v662_v1  ;;  %v665_v5 = vld [vmem:[%s537_s28 + $0x18] sm:$0xff]  ;;  %v565_v6 = vld [vmem:[%s1825_s14] sm:$0xff]  ;;  %v570_v9 = vld [vmem:[%s532_s25 + $0x8] sm:$0xff]  ;;  %p1368_p1 = scmp.ne.s32.totalorder %s1657_s20, 3 }
  0x37   : > { %v569_v7 = vld [vmem:[%s532_s25] sm:$0xff]  ;;  %v1475_v8 = vpack.c.bf16 %v665_v5, %v664_v3  ;;  %1430 = vmatprep.mubr.msk.f32.mxu1 %vm580_vm1, %v565_v6  ;;  %v571_v10 = vld [vmem:[%s532_s25 + $0x10] sm:$0xff]  ;;  %v572_v12 = vld [vmem:[%s532_s25 + $0x18] sm:$0xff] }
  0x38   : > { %1472 = vmatprep.subr.bf16.mxu1 %v1471_v4  ;;  %v1463_v11 = vpack.c.bf16 %v570_v9, %v569_v7  ;;  %v563_v13 = vld [vmem:[%s1820_s27] sm:$0xff]  ;;  %v1467_v14 = vpack.c.bf16 %v572_v12, %v571_v10  ;;  %v566_v15 = vld [vmem:[%s1825_s14 + $0x8] sm:$0xff]  ;;  %vm1488_vm3 = vmpackc.low %vm846_vm2, %vm846_vm2 }
  0x39   : > { %1474 = vmatpush3.bf16.msra.mxu1 %v1471_v4  ;;  %1419 = vmatprep.mubr.msk.f32.mxu0 %vm580_vm1, %v563_v13  ;;  %v564_v16 = vld [vmem:[%s1820_s27 + $0x8] sm:$0xff]  ;;  %v1354_v17 = vld [vmem:[%s548_s2] ss:$0 sm:$0xff]  ;;  %v756_v30 = vld [vmem:[%s1842_s22 + $0x10] sm:$0xff] }
  0x3a   : > { %1476 = vmatprep.subr.bf16.mxu1 %v1475_v8  ;;  %1464 = vmatprep.subr.bf16.mxu0 %v1463_v11  ;;  %v1351_v21 = vld [vmem:[%s545_s19] ss:$0 sm:$0xff]  ;;  %v755_v29 = vld [vmem:[%s1842_s22 + $0x8] sm:$0xff]  ;;  %v757_v32 = vld [vmem:[%s1842_s22 + $0x18] sm:$0xff] }
  0x3b   : > { %1466 = vmatpush3.bf16.msra.mxu0 %v1463_v11  ;;  %v754_v28 = vld [vmem:[%s1842_s22] sm:$0xff]  ;;  %v1483_v34 = vpack.c.bf16 %v757_v32, %v756_v30  ;;  %v568_v35 = vld [vmem:[%s1830_s30 + $0x8] sm:$0xff] }
  0x3c   : > { %1468 = vmatprep.subr.bf16.mxu0 %v1467_v14  ;;  %v1479_v31 = vpack.c.bf16 %v755_v29, %v754_v28  ;;  %v567_v33 = vld [vmem:[%s1830_s30] sm:$0xff]  ;;  %v1123_v3 = vld [vmem:[#allocation2 + $0x8] sm:$0xff] }
  0x3d   : > { %1478 = vmatpush3.bf16.msra.mxu1 %v1475_v8  ;;  %v1357_v53 = vld [vmem:[%s551_s24] ss:$0 sm:$0xff] }
  0x3e   : > { %v1040_v58 = vld [vmem:[%s1860_s4] sm:$0xff] }
  0x3f   : > { %1470 = vmatpush3.bf16.msra.mxu0 %v1467_v14  ;;  %v1122_v4 = vld [vmem:[#allocation2] sm:$0xff] }
  0x40   : > { %1431 = vmatmul.mubr.msk.f32.vlgmr.msra.gmra.mrb[0].mxu1 %vm580_vm1, %v566_v15  ;;  %1480 = vmatprep.subr.bf16.mxu0 %v1479_v31  ;;  %v1369_v10 = vld [vmem:[%s1992_s10] ss:$0 sm:$0xff] (!%p1368_p1) }
  0x42   : > { %1420 = vmatmul.mubr.msk.f32.vlgmr.msra.gmra.mrb[0].mxu0 %vm580_vm1, %v564_v16 }
  0x43   : > { %1441 = vmatprep.mubr.msk.f32.mxu0 %vm580_vm1, %v567_v33  ;;  %1482 = vmatpush3.bf16.msra.mxu0 %v1479_v31 }
  0x44   : > { %1484 = vmatprep.subr.bf16.mxu0 %v1483_v34 }
  0x47   : > { %1486 = vmatpush3.bf16.msra.mxu0 %v1483_v34 }
  0x4a   : > { %1442 = vmatmul.mubr.msk.f32.vlgmr.msra.gmra.mrb[2].mxu0 %vm580_vm1, %v568_v35 }
 0x113   : > { %v1432_v18 = vpop.f32.mrb[0].mxu1 }
 0x114   : > { %v751_v19 = vadd.f32 %v1432_v18, %v1354_v17  ;;  %v745_v20 = vpop.f32.mrb[1].mxu1 }
 0x115   : > { %v746_v22 = vadd.f32 %v1354_v17, %v745_v20  ;;  %v1421_v23 = vpop.f32.mrb[0].mxu0 }
 0x116   : > { %v653_v24 = vpop.f32.mrb[1].mxu0  ;;  %v659_v27 = vadd.f32 %v1421_v23, %v1351_v21 }
 0x117   : > { %v1487_v25 = vpack.c.bf16 %v751_v19, %v746_v22  ;;  %v654_v26 = vadd.f32 %v1351_v21, %v653_v24 }
 0x119   : > { %1489 = vmatprep.subr.msk.bf16.mxu1 %vm1488_vm3, %v1487_v25  ;;  %1448 = vmatprep.mubr.msk.f32.mxu1 %vm846_vm2, %v654_v26 }
 0x11a   : > { %1492 = vmatpush3.bf16.xpose.msk.msra.mxu1 %vm1488_vm3, %v1487_v25 }
 0x11b   : > { %1458 = vmatprep.subr.mxu1 %v1040_v58 }
 0x11d   : > { %v1443_v52 = vpop.f32.mrb[2].mxu0 }
 0x11e   : > { %v837_v54 = vpop.f32.mrb[3].mxu0  ;;  %v843_v55 = vadd.f32 %v1443_v52, %v1357_v53 }
 0x11f   : > { %v838_v56 = vadd.f32 %v1357_v53, %v837_v54 }
 0x121   : > { %1449 = vmatmul.mubr.msk.f32.vlgmr.msra.gmra.mrb[2].mxu1 %vm846_vm2, %v659_v27  ;;  %v1493_v57 = vpack.c.bf16 %v843_v55, %v838_v56 }
 0x122   : > { %1459 = vmatpush3.msra.mxu1 %v1040_v58 }
 0x123   : > { %1494 = vmatprep.subr.bf16.mxu0 %v1493_v57 }
 0x124   : > { %1496 = vmatpush3.bf16.msra.mxu0 %v1493_v57 }
 0x1f4   : > { %v1450_v36 = vpop.f32.mrb[2].mxu1 }
 0x1f5   : > { %v925_v37 = vpop.f32.mrb[3].mxu1  ;;  %v935_v39 = vmul.f32 0.35355338, %v1450_v36 }
 0x1f6   : > { %v934_v38 = vmul.f32 0.35355338, %v925_v37 }
 0x1f7   : > { %v940_v41 = vsel %vm936_vm4, %v935_v39, -inf }
 0x1f8   : > { %v937_v40 = vsel %vm936_vm4, %v934_v38, -inf }
 0x1f9   : > { %938 = vmax.xlane.f32.xlu0 %v937_v40 }
 0x1fd   : > { %941 = vmax.xlane.f32.xlu0 %v940_v41 }
 0x286   : > { %v939_v42 = vpop.xlane.xlu0 %938 }
 0x287   : > { %v943_v43 = vsub.f32 %v934_v38, %v939_v42 }
 0x289   : > { %v945_v44 = vmul.f32 1.442695, %v943_v43 }
 0x28a   : > { %v942_v45 = vpop.xlane.xlu0 %941 }
 0x28b   : > { %1571 = vpow2.f32 %v945_v44  ;;  %v944_v46 = vsub.f32 %v935_v39, %v942_v45 }
 0x28d   : > { %v947_v47 = vmul.f32 1.442695, %v944_v46 }
 0x28f   : > { %1573 = vpow2.f32 %v947_v47 }
 0x295   : > { %v1572_v48 = vpop.eup %1571 }
 0x296   : > { %v949_v49 = vsel %vm936_vm4, %v1572_v48, 0.0 }
 0x297   : > { %950 = vadd.xlane.f32.xlu1 %v949_v49 }
 0x299   : > { %v1574_v50 = vpop.eup %1573 }
 0x29a   : > { %v952_v51 = vsel %vm936_vm4, %v1574_v50, 0.0 }
 0x29b   : > { %953 = vadd.xlane.f32.xlu1 %v952_v51 }
 0x324   : > { %v951_v59 = vpop.xlane.xlu1 %950 }
 0x325   : > { %1575 = vrcp.f32 %v951_v59 }
 0x328   : > { %v954_v60 = vpop.xlane.xlu1 %953 }
 0x329   : > { %1577 = vrcp.f32 %v954_v60 }
 0x32f   : > { %v1576_v61 = vpop.eup %1575 }
 0x330   : > { %v956_v62 = vmul.f32 %v1576_v61, %v1572_v48 }
 0x332   : > { %1455 = vmatprep.mubr.msk.f32.mxu0 %vm936_vm4, %v956_v62 }
 0x333   : > { %v1578_v63 = vpop.eup %1577 }
 0x334   : > { %v958_v0 = vmul.f32 %v1578_v63, %v1574_v50 }
 0x336   : > { %1456 = vmatmul.mubr.msk.f32.vlgmr.msra.gmra.mrb[4].mxu0 %vm936_vm4, %v958_v0 }
 0x409   : > { %v1457_v1 = vpop.f32.mrb[4].mxu0 }
 0x40a   : > { %v1031_v2 = vpop.f32.mrb[5].mxu0 }
 0x40b   : > { %1460 = vmatprep.mubr.msk.f32.mxu1 %vm846_vm2, %v1031_v2 }
 0x40c   : > { %1461 = vmatmul.mubr.msk.f32.vlgmr.msra.gmra.mrb[4].mxu1 %vm846_vm2, %v1457_v1 }
 0x4dd   : > { %1131 = sbr.rel (%p1368_p1) target bundleno = 1262 (0x4ee), region = 72 }
 0x4df   : > { %v1462_v5 = vpop.f32.mrb[4].mxu1 }
 0x4e0   : > { %v1125_v6 = vadd.f32 %v1462_v5, %v1123_v3  ;;  %v1113_v7 = vpop.f32.mrb[5].mxu1 }
 0x4e1   : > { %v1124_v8 = vadd.f32 %v1122_v4, %v1113_v7 }
 0x4e2   : > { %1127 = vst.msk [vmem:[#allocation2 + $0x8] sm:$0xff] %vm580_vm1, %v1125_v6 }
 0x4e3   : > { %1126 = vst.msk [vmem:[#allocation2] sm:$0xff] %vm580_vm1, %v1124_v8 }
 0x4e9   : > { %v1133_v11 = vld [vmem:[#allocation2 + $0x8] sm:$0xff] }
 0x4ea   : > { %v1132_v9 = vld [vmem:[#allocation2] sm:$0xff]  ;;  %v1142_v13 = vadd.f32 %v1369_v10, %v1133_v11 }
 0x4eb   : > { %v1141_v12 = vadd.f32 %v1369_v10, %v1132_v9 }
 0x4ec   : > { %1144 = vst.msk [vmem:[%s1862_s0 + $0x8] sm:$0xff] %vm580_vm1, %v1142_v13 }
 0x4ed   : > { %1143 = vst.msk [vmem:[%s1862_s0] sm:$0xff] %vm580_vm1, %v1141_v12 }
 0x4ee PF: > { %s2033_s14 = sld [smem:[#allocation9_spill]]  ;;  %s2036_s13 = sld [smem:[#allocation23_spill]] }
 0x4ef   : > { %s2034_s16 = sld [smem:[#allocation7_spill]]  ;;  %s1159_s23 = sshll.u32 %s1862_s0, 4  ;;  %s1926_s23 = int_to_ptr.vmem [resolvable:$true] %s1159_s23 }
 0x4f0   : > { %s1579_s12 = scalar_lea.vmem %s1926_s23, 256  ;;  %s1676_s11 = smov [#allocation3]  }
 0x4f1   : > { %p1580_p2 = scmp.ne.s32.totalorder %s1926_s23, %s1579_s12  ;;  %s1583_s24 = sshll.u32 %s1676_s11, 4  ;;  %s1584_s24 = int_to_ptr.vmem [resolvable:$false] %s1583_s24 }
 0x4f2   : > { %s1585_s18 = scalar_lea.vmem %s1584_s24, 512  ;;  %p1586_p6 = scmp.lt.s32.totalorder %s1926_s23, %s1584_s24 }
 0x4f3   : > { %p1581_p4 = pnand %p1580_p2, %p1788_p3  ;;  %p1587_p7 = scmp.lt.s32.totalorder %s1585_s18, %s1579_s12 }
 0x4f4   : > { %s1381_s26 = sshll.u32 %s2033_s14, 8 }
 0x4f5   : > { %s1923_s22 = scalar_lea.hbm %s2036_s13, %s1381_s26  ;;  %s2037_s19 = sand.u32 1, %s2034_s16  }
 0x4f6   : > { %s1930_s15 = scalar_lea.sflag [#allocation4], %s2037_s19  ;;  %p1582_p5 = pneg %p1581_p4 }
 0x4f7   : > { %p1588_p8 = por %p1587_p7, %p1586_p6 }
 0x4f9   : > { %p1589_p10 = pnand %p1588_p8, %p1582_p5 }
 0x4fb   : > { %1592 = shalt.err (!%p1589_p10)
}
 0x4fc   : > { %s1593_s29 = scalar_lea.hbm %s1923_s22, 256  ;;  %s1597_s3 = scalar_lea.hbm %s2036_s13, 512 }
 0x4fd   : > { %p1594_p11 = scmp.ne.s32.totalorder %s1923_s22, %s1593_s29  ;;  %p1598_p0 = scmp.lt.u32.totalorder %s1923_s22, %s2036_s13 }
 0x4fe   : > { %p1599_p1 = scmp.lt.u32.totalorder %s1597_s3, %s1593_s29  ;;  %p1601_p4 = scmp.lt.u32.totalorder %s1593_s29, %s1923_s22 }
 0x4ff   : > { %p1595_p12 = pnand %p1594_p11, %p1788_p3 }
 0x500   : > { %p1600_p2 = por %p1599_p1, %p1598_p0 }
 0x501   : > { %p1596_p13 = pneg %p1595_p12 }
 0x502   : > { %p1602_p5 = por %p1601_p4, %p1600_p2 }
 0x504   : > { %p1603_p6 = pnand %p1602_p5, %p1596_p13 }
 0x506   : > { %1606 = shalt.err (!%p1603_p6)
}
 0x507   : > { %s1677_s2 = smov 128   ;;  %s1678_s27 = smov 8  }
 0x508   : > { %1497 = dma.vmem_to_hbm [thread:$0]  (%p1788_p3), %s1926_s23, 256, %s1923_s22, %s1930_s15, %s1677_s2, %s1677_s2, %s1678_s27  }
 0x509 PF: > { %s2038_s4 = sld [smem:[#allocation12_spill]]  ;;  %s2039_s30 = sld [smem:[#allocation6_spill]] }
 0x50f   : > { %p1503_p7 = scmp.ge.s32.totalorder %s2038_s4, 2  ;;  %s1174_s16 = sand.u32 1, %s2039_s30  }
 0x510   : > { %s1175_s26 = scalar_lea.sflag [#allocation4], %s1174_s16 }
 0x511   : > { %p1500_p8 = pnand %p1503_p7, %p1798_p9 }
 0x513   : > { %1640 = dma.done.wait (!%p1500_p8), %s1175_s26, 256  }
 0x514   : > { %1642 = vsyncadd (!%p1500_p8), %s1175_s26, 4294967040  ;;  %s24_s24 = sadd.s32 1, %s2038_s4   ;;  %s2041_s17 = sld [smem:[#allocation7_spill]] }
 0x515   : > { %p21_p10 = scmp.ge.s32.totalorder %s24_s24, 10   ;;  %s2042_s18 = sld [smem:[#allocation8_spill]] }
 0x516   : > { %s2043_s19 = sld [smem:[#allocation17_spill]]  ;;  %s2044_s20 = sld [smem:[#allocation10_spill]] }
 0x517   : > { %s2045_s21 = sld [smem:[#allocation11_spill]]  ;;  %s2046_s22 = sld [smem:[#allocation13_spill]] }
 0x518   : > { %s2047_s23 = sld [smem:[#allocation15_spill]]  ;;  %23 = sbr.rel (!%p21_p10) target bundleno = 12 (0xc), region = 134 }
 0x51f   :  { %1180 = vsyncpa [#allocation4], 1 }
 0x520   :  { %1182 = vsyncpa [#allocation4 + $0x1], 1 }

</bundles_post_ra>
